<compile_context>
chip_gen: v5e
topology: v5e:2x2
jax: 0.10.0
libtpu: 0.0.40
codegen_flags: <defaults>
</compile_context>

<pallas_src>
import jax
import jax.numpy as jnp
from jax import lax
from jax.experimental import pallas as pl
from jax.experimental.pallas import tpu as pltpu

EPS = 1e-5  # nn.BatchNorm2d default eps


def _round_up(x, m):
    return (x + m - 1) // m * m


# --------------------------------------------------------------------------
# Pass 1: conv GEMM tile + per-tile partial BN stats (sum, sum of squares).
# --------------------------------------------------------------------------
def _conv_stats_kernel(a_ref, w_ref, y_ref, sum_ref, ssq_ref):
    # a: (TM, K) f32 im2col rows, w: (K, OCP) f32, y: (TM, OCP) f32
    # sum/ssq: (8, OCP) f32 (sublane-broadcast partials for this tile)
    y = jnp.dot(a_ref[...], w_ref[...], preferred_element_type=jnp.float32)
    y_ref[...] = y
    s = jnp.sum(y, axis=0, keepdims=True)         # (1, OCP) — XLU reduce
    sq = jnp.sum(y * y, axis=0, keepdims=True)
    sum_ref[...] = jnp.broadcast_to(s, sum_ref.shape)
    ssq_ref[...] = jnp.broadcast_to(sq, ssq_ref.shape)


# --------------------------------------------------------------------------
# Pass 2: per-channel affine (folded mean/var/gamma/beta) + ReLU, lane-dense.
# --------------------------------------------------------------------------
def _bn_relu_kernel(y_ref, scale_ref, shift_ref, o_ref):
    y = y_ref[...]
    o_ref[...] = jnp.maximum(y * scale_ref[...] + shift_ref[...], 0.0).astype(o_ref.dtype)


def conv_bn_relu(x, weight, bias, gamma, beta, *, stride=1, padding=0, block_m=1024):
    """x: (N, C, H, W) f32; weight: (OC, C, KH, KW); bias/gamma/beta: (OC,)."""
    N, C, H, W = x.shape
    OC, _, KH, KW = weight.shape
    OH = (H + 2 * padding - KH) // stride + 1
    OW = (W + 2 * padding - KW) // stride + 1
    M = N * OH * OW
    K = C * KH * KW
    OCP = _round_up(OC, 128)          # lane-dense output channels

    # Conv bias cancels exactly under training-mode BatchNorm:
    # mean(y+b) = mean(y)+b, so (y+b)-mean(y+b) = y-mean(y) and var is unchanged.
    del bias

    # im2col patches via XLA (feature order is (C, KH, KW), matching
    # weight.reshape(OC, C*KH*KW)).
    # TODO(synk): avoid materializing im2col (KH*KW x HBM inflation) by streaming
    # NHWC x and accumulating KH*KW shifted (TM, C)x(C, OCP) matmuls in-kernel.
    patches = lax.conv_general_dilated_patches(
        x, filter_shape=(KH, KW), window_strides=(stride, stride),
        padding=[(padding, padding), (padding, padding)])   # (N, C*KH*KW, OH, OW)
    a = patches.transpose(0, 2, 3, 1).reshape(M, K)

    tm = min(block_m, _round_up(M, 8))
    m_pad = _round_up(M, tm)
    g = m_pad // tm
    if m_pad != M:
        a = jnp.pad(a, ((0, m_pad - M), (0, 0)))   # zero rows: contribute 0 to stats

    # (K, OCP) weight matrix, zero-padded columns for the unused channels.
    w_mat = jnp.pad(weight.reshape(OC, K).T, ((0, 0), (0, OCP - OC)))

    cost1 = pl.CostEstimate(
        flops=2 * m_pad * K * OCP + 3 * m_pad * OCP,
        transcendentals=0,
        bytes_accessed=4 * (m_pad * K + K * OCP + m_pad * OCP + 2 * g * 8 * OCP))

    y, psum, pssq = pl.pallas_call(
        _conv_stats_kernel,
        out_shape=(
            jax.ShapeDtypeStruct((m_pad, OCP), jnp.float32),
            jax.ShapeDtypeStruct((g, 8, OCP), jnp.float32),
            jax.ShapeDtypeStruct((g, 8, OCP), jnp.float32),
        ),
        grid=(g,),
        in_specs=[
            pl.BlockSpec((tm, K), lambda i: (i, 0)),
            pl.BlockSpec((K, OCP), lambda i: (0, 0)),
        ],
        out_specs=(
            pl.BlockSpec((tm, OCP), lambda i: (i, 0)),
            pl.BlockSpec((None, 8, OCP), lambda i: (i, 0, 0)),
            pl.BlockSpec((None, 8, OCP), lambda i: (i, 0, 0)),
        ),
        compiler_params=pltpu.CompilerParams(
            dimension_semantics=("parallel",),
            vmem_limit_bytes=32 * 1024 * 1024),
        cost_estimate=cost1,
    )(a, w_mat)

    # Combine per-tile partial stats into global training-mode BN stats.
    # (Padded rows are zero so they add nothing; divide by the true count M.)
    tot = jnp.sum(psum[:, 0, :], axis=0)           # (OCP,)
    tot2 = jnp.sum(pssq[:, 0, :], axis=0)
    mean = tot / M
    var = jnp.maximum(tot2 / M - mean * mean, 0.0)  # f32 accumulation; clamp cancellation
    inv = lax.rsqrt(var + EPS)

    gamma_p = jnp.pad(gamma, (0, OCP - OC))         # padded channels -> scale/shift = 0
    beta_p = jnp.pad(beta, (0, OCP - OC))
    scale = (gamma_p * inv).reshape(1, OCP)
    shift = (beta_p - mean * gamma_p * inv).reshape(1, OCP)

    cost2 = pl.CostEstimate(
        flops=3 * m_pad * OCP,
        transcendentals=0,
        bytes_accessed=4 * (2 * m_pad * OCP + 2 * OCP))

    out2d = pl.pallas_call(
        _bn_relu_kernel,
        out_shape=jax.ShapeDtypeStruct((m_pad, OCP), jnp.float32),
        grid=(g,),
        in_specs=[
            pl.BlockSpec((tm, OCP), lambda i: (i, 0)),
            pl.BlockSpec((1, OCP), lambda i: (0, 0)),
            pl.BlockSpec((1, OCP), lambda i: (0, 0)),
        ],
        out_specs=pl.BlockSpec((tm, OCP), lambda i: (i, 0)),
        compiler_params=pltpu.CompilerParams(
            dimension_semantics=("parallel",),
            vmem_limit_bytes=32 * 1024 * 1024),
        cost_estimate=cost2,
    )(y, scale, shift)

    # Slice padding off and return NCHW to match the PyTorch module's contract.
    return out2d[:M, :OC].reshape(N, OH, OW, OC).transpose(0, 3, 1, 2)


conv_bn_relu_jit = jax.jit(conv_bn_relu,
                           static_argnames=("stride", "padding", "block_m"))


def _reference(x, weight, bias, gamma, beta, *, stride=1, padding=0):
    y = lax.conv_general_dilated(
        x, weight, window_strides=(stride, stride),
        padding=[(padding, padding), (padding, padding)],
        dimension_numbers=("NCHW", "OIHW", "NCHW"))
    y = y + bias.reshape(1, -1, 1, 1)
    mean = jnp.mean(y, axis=(0, 2, 3), keepdims=True)
    var = jnp.mean(jnp.square(y - mean), axis=(0, 2, 3), keepdims=True)
    y = (y - mean) * lax.rsqrt(var + EPS)
    y = y * gamma.reshape(1, -1, 1, 1) + beta.reshape(1, -1, 1, 1)
    return jnp.maximum(y, 0.0)


if __name__ == "__main__":
    # Module config: ConvBnRelu(in_channels=4, out_channels=8, kernel_size=3,
    #                           stride=1, padding=0)
    N, C, H, W = 2, 4, 16, 16
    OC, KH, KW = 8, 3, 3

    key = jax.random.PRNGKey(0)
    kx, kw_, kb, kg, kbeta = jax.random.split(key, 5)
    x = jax.random.normal(kx, (N, C, H, W), jnp.float32)
    weight = jax.random.normal(kw_, (OC, C, KH, KW), jnp.float32) * 0.1
    bias = jax.random.normal(kb, (OC,), jnp.float32) * 0.1
    gamma = 1.0 + 0.1 * jax.random.normal(kg, (OC,), jnp.float32)
    beta = 0.1 * jax.random.normal(kbeta, (OC,), jnp.float32)

    out = conv_bn_relu_jit(x, weight, bias, gamma, beta, stride=1, padding=0)
    out = jax.block_until_ready(out)

    ref = _reference(x, weight, bias, gamma, beta, stride=1, padding=0)
    assert out.shape == (N, OC, H - KH + 1, W - KW + 1), out.shape
    assert jnp.allclose(out, ref, atol=1e-4, rtol=1e-4), "mismatch vs reference"
    print("KERNEL_OK")
</pallas_src>

<mosaic_0001>
module attributes {stable_mosaic.version = 11 : i64} {
  func.func @_conv_stats_kernel(%arg0: i32, %arg1: memref<392x36xf32, #tpu.memory_space<vmem>>, %arg2: memref<36x128xf32, #tpu.memory_space<vmem>>, %arg3: memref<392x128xf32, #tpu.memory_space<vmem>>, %arg4: memref<1x8x128xf32, #tpu.memory_space<vmem>>, %arg5: memref<1x8x128xf32, #tpu.memory_space<vmem>>) attributes {dimension_semantics = [#tpu.dimension_semantics<parallel>], iteration_bounds = array<i64: 1>, scalar_prefetch = 0 : i64, scratch_operands = 0 : i64, tpu.core_type = #tpu.core_type<tc>, window_params = [{transform_indices = @transform_0, window_bounds = array<i64: 392, 36>}, {pipeline_mode = #tpu.pipeline_mode<synchronous>, transform_indices = @transform_1, window_bounds = array<i64: 36, 128>}, {transform_indices = @transform_2, window_bounds = array<i64: 392, 128>}, {transform_indices = @transform_3, window_bounds = array<i64: 1, 8, 128>}, {transform_indices = @transform_4, window_bounds = array<i64: 1, 8, 128>}]} {
    %c0 = arith.constant 0 : index
    %c0_0 = arith.constant 0 : index
    %0 = vector.load %arg1[%c0, %c0_0] : memref<392x36xf32, #tpu.memory_space<vmem>>, vector<392x36xf32>
    %c0_1 = arith.constant 0 : index
    %c0_2 = arith.constant 0 : index
    %1 = vector.load %arg2[%c0_1, %c0_2] : memref<36x128xf32, #tpu.memory_space<vmem>>, vector<36x128xf32>
    %cst = arith.constant dense<0.000000e+00> : vector<392x128xf32>
    %2 = tpu.matmul %0, %1, %cst {dimension_numbers = #tpu.dot_dimension_numbers<[1], [0], [0], [1], [0, 0, 1, 1], [], []>} : vector<392x36xf32>, vector<36x128xf32>, vector<392x128xf32> -> vector<392x128xf32>
    %c0_3 = arith.constant 0 : index
    %c0_4 = arith.constant 0 : index
    %3 = vector.load %arg3[%c0_3, %c0_4] : memref<392x128xf32, #tpu.memory_space<vmem>>, vector<392x128xf32>
    tpu.vector_store %arg3[%c0_3, %c0_4], %2 {strides = array<i32>} : memref<392x128xf32, #tpu.memory_space<vmem>>, vector<392x128xf32>,
    %cst_5 = arith.constant dense<0.000000e+00> : vector<128xf32>
    %4 = vector.multi_reduction <add>, %2, %cst_5 [0] : vector<392x128xf32> to vector<128xf32>
    %5 = vector.shape_cast %4 : vector<128xf32> to vector<1x128xf32>
    %6 = arith.mulf %2, %2 : vector<392x128xf32>
    %cst_6 = arith.constant dense<0.000000e+00> : vector<128xf32>
    %7 = vector.multi_reduction <add>, %6, %cst_6 [0] : vector<392x128xf32> to vector<128xf32>
    %8 = vector.shape_cast %7 : vector<128xf32> to vector<1x128xf32>
    %9 = vector.shape_cast %5 : vector<1x128xf32> to vector<1x128xf32>
    %10 = vector.broadcast %9 : vector<1x128xf32> to vector<8x128xf32>
    %c0_7 = arith.constant 0 : index
    %c0_8 = arith.constant 0 : index
    %c0_9 = arith.constant 0 : index
    %11 = vector.load %arg4[%c0_7, %c0_8, %c0_9] : memref<1x8x128xf32, #tpu.memory_space<vmem>>, vector<1x8x128xf32>
    %12 = vector.shape_cast %11 : vector<1x8x128xf32> to vector<8x128xf32>
    %13 = vector.shape_cast %10 : vector<8x128xf32> to vector<1x8x128xf32>
    tpu.vector_store %arg4[%c0_7, %c0_8, %c0_9], %13 {strides = array<i32>} : memref<1x8x128xf32, #tpu.memory_space<vmem>>, vector<1x8x128xf32>,
    %14 = vector.shape_cast %8 : vector<1x128xf32> to vector<1x128xf32>
    %15 = vector.broadcast %14 : vector<1x128xf32> to vector<8x128xf32>
    %c0_10 = arith.constant 0 : index
    %c0_11 = arith.constant 0 : index
    %c0_12 = arith.constant 0 : index
    %16 = vector.load %arg5[%c0_10, %c0_11, %c0_12] : memref<1x8x128xf32, #tpu.memory_space<vmem>>, vector<1x8x128xf32>
    %17 = vector.shape_cast %16 : vector<1x8x128xf32> to vector<8x128xf32>
    %18 = vector.shape_cast %15 : vector<8x128xf32> to vector<1x8x128xf32>
    tpu.vector_store %arg5[%c0_10, %c0_11, %c0_12], %18 {strides = array<i32>} : memref<1x8x128xf32, #tpu.memory_space<vmem>>, vector<1x8x128xf32>,
    return
  }
  func.func @transform_0(%arg0: i32) -> (i32, i32) {
    %c0_i32 = arith.constant 0 : i32
    %c0_i32_0 = arith.constant 0 : i32
    return %arg0, %c0_i32 : i32, i32
  }
  func.func @transform_1(%arg0: i32) -> (i32, i32) {
    %c0_i32 = arith.constant 0 : i32
    %c0_i32_0 = arith.constant 0 : i32
    %c0_i32_1 = arith.constant 0 : i32
    return %c0_i32, %c0_i32_0 : i32, i32
  }
  func.func @transform_2(%arg0: i32) -> (i32, i32) {
    %c0_i32 = arith.constant 0 : i32
    %c0_i32_0 = arith.constant 0 : i32
    return %arg0, %c0_i32 : i32, i32
  }
  func.func @transform_3(%arg0: i32) -> (i32, i32, i32) {
    %c0_i32 = arith.constant 0 : i32
    %c0_i32_0 = arith.constant 0 : i32
    %c0_i32_1 = arith.constant 0 : i32
    return %arg0, %c0_i32, %c0_i32_0 : i32, i32, i32
  }
  func.func @transform_4(%arg0: i32) -> (i32, i32, i32) {
    %c0_i32 = arith.constant 0 : i32
    %c0_i32_0 = arith.constant 0 : i32
    %c0_i32_1 = arith.constant 0 : i32
    return %arg0, %c0_i32, %c0_i32_0 : i32, i32, i32
  }
}

module attributes {stable_mosaic.version = 11 : i64} {
  func.func @_bn_relu_kernel(%arg0: i32, %arg1: memref<392x128xf32, #tpu.memory_space<vmem>>, %arg2: memref<1x128xf32, #tpu.memory_space<vmem>>, %arg3: memref<1x128xf32, #tpu.memory_space<vmem>>, %arg4: memref<392x128xf32, #tpu.memory_space<vmem>>) attributes {dimension_semantics = [#tpu.dimension_semantics<parallel>], iteration_bounds = array<i64: 1>, scalar_prefetch = 0 : i64, scratch_operands = 0 : i64, tpu.core_type = #tpu.core_type<tc>, window_params = [{transform_indices = @transform_0, window_bounds = array<i64: 392, 128>}, {pipeline_mode = #tpu.pipeline_mode<synchronous>, transform_indices = @transform_1, window_bounds = array<i64: 1, 128>}, {pipeline_mode = #tpu.pipeline_mode<synchronous>, transform_indices = @transform_2, window_bounds = array<i64: 1, 128>}, {transform_indices = @transform_3, window_bounds = array<i64: 392, 128>}]} {
    %c0 = arith.constant 0 : index
    %c0_0 = arith.constant 0 : index
    %0 = vector.load %arg1[%c0, %c0_0] : memref<392x128xf32, #tpu.memory_space<vmem>>, vector<392x128xf32>
    %c0_1 = arith.constant 0 : index
    %c0_2 = arith.constant 0 : index
    %1 = vector.load %arg2[%c0_1, %c0_2] : memref<1x128xf32, #tpu.memory_space<vmem>>, vector<1x128xf32>
    %2 = vector.broadcast %1 : vector<1x128xf32> to vector<392x128xf32>
    %3 = arith.mulf %0, %2 : vector<392x128xf32>
    %c0_3 = arith.constant 0 : index
    %c0_4 = arith.constant 0 : index
    %4 = vector.load %arg3[%c0_3, %c0_4] : memref<1x128xf32, #tpu.memory_space<vmem>>, vector<1x128xf32>
    %5 = vector.broadcast %4 : vector<1x128xf32> to vector<392x128xf32>
    %6 = arith.addf %3, %5 : vector<392x128xf32>
    %cst = arith.constant 0.000000e+00 : f32
    %7 = vector.broadcast %cst : f32 to vector<392x128xf32>
    %8 = arith.maximumf %6, %7 : vector<392x128xf32>
    %c0_5 = arith.constant 0 : index
    %c0_6 = arith.constant 0 : index
    %9 = vector.load %arg4[%c0_5, %c0_6] : memref<392x128xf32, #tpu.memory_space<vmem>>, vector<392x128xf32>
    tpu.vector_store %arg4[%c0_5, %c0_6], %8 {strides = array<i32>} : memref<392x128xf32, #tpu.memory_space<vmem>>, vector<392x128xf32>,
    return
  }
  func.func @transform_0(%arg0: i32) -> (i32, i32) {
    %c0_i32 = arith.constant 0 : i32
    %c0_i32_0 = arith.constant 0 : i32
    return %arg0, %c0_i32 : i32, i32
  }
  func.func @transform_1(%arg0: i32) -> (i32, i32) {
    %c0_i32 = arith.constant 0 : i32
    %c0_i32_0 = arith.constant 0 : i32
    %c0_i32_1 = arith.constant 0 : i32
    return %c0_i32, %c0_i32_0 : i32, i32
  }
  func.func @transform_2(%arg0: i32) -> (i32, i32) {
    %c0_i32 = arith.constant 0 : i32
    %c0_i32_0 = arith.constant 0 : i32
    %c0_i32_1 = arith.constant 0 : i32
    return %c0_i32, %c0_i32_0 : i32, i32
  }
  func.func @transform_3(%arg0: i32) -> (i32, i32) {
    %c0_i32 = arith.constant 0 : i32
    %c0_i32_0 = arith.constant 0 : i32
    return %arg0, %c0_i32 : i32, i32
  }
}

</mosaic_0001>

<bundles_post_ra>
// kernel: conv_bn_relu.3
= control target key start
LH: loop header
LB: loop body
LE: loop exit
PB: predicated region body
PF: predicated region fallthrough
CT: control target
= control target key end

     0   :  { %s695_s0 = inlined_call_operand.vmem [shape: f32[392,128], index: 0, kind: input, shape index: {}]   ;;  %s696_s1 = inlined_call_operand.vmem [shape: f32[1,128], index: 1, kind: input, shape index: {}]   ;;  %s697_s2 = inlined_call_operand.vmem [shape: f32[1,128], index: 2, kind: input, shape index: {}]   ;;  %s698_s3 = inlined_call_operand.vmem [shape: f32[392,128], index: 3, kind: output, shape index: {}]  }
   0x1   :  { %v14_v0 = vld [vmem:[%s695_s0] sm:$0xff]  ;;  %v15_v3 = vld [vmem:[%s695_s0 + $0x8] sm:$0xff]  ;;  %v16_v6 = vld [vmem:[%s695_s0 + $0x10] sm:$0xff] }
   0x2   :  { %v299_v1 = vld [vmem:[%s696_s1] ss:$0 sm:$0xff]  ;;  %v17_v7 = vld [vmem:[%s695_s0 + $0x18] sm:$0xff]  ;;  %v19_v12 = vld [vmem:[%s695_s0 + $0x28] sm:$0xff] }
   0x3   :  { %v304_v2 = vld [vmem:[%s697_s2] ss:$0 sm:$0xff]  ;;  %v67_v4 = vmul.f32 %v299_v1, %v14_v0  ;;  %v68_v5 = vmul.f32 %v299_v1, %v15_v3  ;;  %v69_v9 = vmul.f32 %v299_v1, %v16_v6  ;;  %v70_v10 = vmul.f32 %v299_v1, %v17_v7  ;;  %v20_v13 = vld [vmem:[%s695_s0 + $0x30] sm:$0xff]  ;;  %v21_v14 = vld [vmem:[%s695_s0 + $0x38] sm:$0xff] }
   0x4   :  { %v18_v8 = vld [vmem:[%s695_s0 + $0x20] sm:$0xff]  ;;  %v72_v17 = vmul.f32 %v299_v1, %v19_v12  ;;  %v73_v18 = vmul.f32 %v299_v1, %v20_v13  ;;  %v74_v22 = vmul.f32 %v299_v1, %v21_v14  ;;  %v23_v24 = vld [vmem:[%s695_s0 + $0x48] sm:$0xff]  ;;  %v24_v29 = vld [vmem:[%s695_s0 + $0x50] sm:$0xff] }
   0x5   :  { %v71_v11 = vmul.f32 %v299_v1, %v18_v8  ;;  %v120_v15 = vadd.f32 %v304_v2, %v67_v4  ;;  %v121_v16 = vadd.f32 %v304_v2, %v68_v5  ;;  %v122_v19 = vadd.f32 %v304_v2, %v69_v9  ;;  %v22_v23 = vld [vmem:[%s695_s0 + $0x40] sm:$0xff]  ;;  %v25_v30 = vld [vmem:[%s695_s0 + $0x58] sm:$0xff]  ;;  %v27_v35 = vld [vmem:[%s695_s0 + $0x68] sm:$0xff] }
   0x6   :  { %v123_v20 = vadd.f32 %v304_v2, %v70_v10  ;;  %v125_v27 = vadd.f32 %v304_v2, %v72_v17  ;;  %v126_v28 = vadd.f32 %v304_v2, %v73_v18  ;;  %v26_v31 = vld [vmem:[%s695_s0 + $0x60] sm:$0xff]  ;;  %v127_v34 = vadd.f32 %v304_v2, %v74_v22  ;;  %v28_v36 = vld [vmem:[%s695_s0 + $0x70] sm:$0xff]  ;;  %v29_v41 = vld [vmem:[%s695_s0 + $0x78] sm:$0xff] }
   0x7   :  { %v124_v21 = vadd.f32 %v304_v2, %v71_v11  ;;  %v169_v25 = vmax.f32 %v120_v15, 0.0  ;;  %v170_v26 = vmax.f32 %v121_v16, 0.0  ;;  %v171_v32 = vmax.f32 %v122_v19, 0.0  ;;  %v30_v54 = vld [vmem:[%s695_s0 + $0x80] sm:$0xff]  ;;  %v31_v55 = vld [vmem:[%s695_s0 + $0x88] sm:$0xff]  ;;  %v32_v58 = vld [vmem:[%s695_s0 + $0x90] sm:$0xff] }
   0x8   :  { %v172_v33 = vmax.f32 %v123_v20, 0.0  ;;  %v174_v38 = vmax.f32 %v125_v27, 0.0  ;;  %v75_v39 = vmul.f32 %v299_v1, %v22_v23  ;;  %v76_v40 = vmul.f32 %v299_v1, %v23_v24  ;;  %v33_v59 = vld [vmem:[%s695_s0 + $0x98] sm:$0xff]  ;;  %v34_v62 = vld [vmem:[%s695_s0 + $0xa0] sm:$0xff]  ;;  %v35_v5 = vld [vmem:[%s695_s0 + $0xa8] sm:$0xff] }
   0x9   :  { %218 = vst [vmem:[%s698_s3] sm:$0xff] %v169_v25  ;;  %v173_v37 = vmax.f32 %v124_v21, 0.0  ;;  %v175_v42 = vmax.f32 %v126_v28, 0.0  ;;  %v77_v43 = vmul.f32 %v299_v1, %v24_v29  ;;  %v78_v44 = vmul.f32 %v299_v1, %v25_v30  ;;  %v36_v10 = vld [vmem:[%s695_s0 + $0xb0] sm:$0xff]  ;;  %v37_v14 = vld [vmem:[%s695_s0 + $0xb8] sm:$0xff]  ;;  %v38_v18 = vld [vmem:[%s695_s0 + $0xc0] sm:$0xff] }
   0xa   :  { %219 = vst [vmem:[%s698_s3 + $0x8] sm:$0xff] %v170_v26  ;;  %v79_v45 = vmul.f32 %v299_v1, %v26_v31  ;;  %v128_v46 = vadd.f32 %v304_v2, %v75_v39  ;;  %v129_v47 = vadd.f32 %v304_v2, %v76_v40  ;;  %v80_v48 = vmul.f32 %v299_v1, %v27_v35  ;;  %v39_v22 = vld [vmem:[%s695_s0 + $0xc8] sm:$0xff]  ;;  %v40_v26 = vld [vmem:[%s695_s0 + $0xd0] sm:$0xff]  ;;  %v41_v30 = vld [vmem:[%s695_s0 + $0xd8] sm:$0xff] }
   0xb   :  { %220 = vst [vmem:[%s698_s3 + $0x10] sm:$0xff] %v171_v32  ;;  %v81_v49 = vmul.f32 %v299_v1, %v28_v36  ;;  %v176_v50 = vmax.f32 %v127_v34, 0.0  ;;  %v130_v51 = vadd.f32 %v304_v2, %v77_v43  ;;  %v131_v52 = vadd.f32 %v304_v2, %v78_v44  ;;  %v42_v34 = vld [vmem:[%s695_s0 + $0xe0] sm:$0xff] }
   0xc   :  { %221 = vst [vmem:[%s698_s3 + $0x18] sm:$0xff] %v172_v33  ;;  %v82_v53 = vmul.f32 %v299_v1, %v29_v41  ;;  %v177_v56 = vmax.f32 %v128_v46, 0.0  ;;  %v132_v57 = vadd.f32 %v304_v2, %v79_v45  ;;  %v178_v60 = vmax.f32 %v129_v47, 0.0  ;;  %v45_v46 = vld [vmem:[%s695_s0 + $0xf8] sm:$0xff] }
   0xd   :  { %222 = vst [vmem:[%s698_s3 + $0x20] sm:$0xff] %v173_v37  ;;  %v133_v61 = vadd.f32 %v304_v2, %v80_v48  ;;  %v179_v63 = vmax.f32 %v130_v51, 0.0  ;;  %v134_v0 = vadd.f32 %v304_v2, %v81_v49  ;;  %v83_v3 = vmul.f32 %v299_v1, %v30_v54  ;;  %v47_v54 = vld [vmem:[%s695_s0 + $0x108] sm:$0xff] }
   0xe   :  { %223 = vst [vmem:[%s698_s3 + $0x28] sm:$0xff] %v174_v38  ;;  %v84_v4 = vmul.f32 %v299_v1, %v31_v55  ;;  %v180_v6 = vmax.f32 %v131_v52, 0.0  ;;  %v135_v7 = vadd.f32 %v304_v2, %v82_v53  ;;  %v85_v8 = vmul.f32 %v299_v1, %v32_v58  ;;  %v43_v38 = vld [vmem:[%s695_s0 + $0xe8] sm:$0xff]  ;;  %v48_v58 = vld [vmem:[%s695_s0 + $0x110] sm:$0xff] }
   0xf   :  { %224 = vst [vmem:[%s698_s3 + $0x30] sm:$0xff] %v175_v42  ;;  %v86_v9 = vmul.f32 %v299_v1, %v33_v59  ;;  %v181_v11 = vmax.f32 %v132_v57, 0.0  ;;  %v136_v12 = vadd.f32 %v304_v2, %v83_v3  ;;  %v87_v13 = vmul.f32 %v299_v1, %v34_v62  ;;  %v44_v42 = vld [vmem:[%s695_s0 + $0xf0] sm:$0xff]  ;;  %v49_v62 = vld [vmem:[%s695_s0 + $0x118] sm:$0xff] }
  0x10   :  { %225 = vst [vmem:[%s698_s3 + $0x38] sm:$0xff] %v176_v50  ;;  %v182_v15 = vmax.f32 %v133_v61, 0.0  ;;  %v137_v16 = vadd.f32 %v304_v2, %v84_v4  ;;  %v88_v17 = vmul.f32 %v299_v1, %v35_v5  ;;  %v183_v19 = vmax.f32 %v134_v0, 0.0  ;;  %v46_v50 = vld [vmem:[%s695_s0 + $0x100] sm:$0xff] }
  0x11   :  { %226 = vst [vmem:[%s698_s3 + $0x40] sm:$0xff] %v177_v56  ;;  %v138_v20 = vadd.f32 %v304_v2, %v85_v8  ;;  %v89_v21 = vmul.f32 %v299_v1, %v36_v10  ;;  %v184_v23 = vmax.f32 %v135_v7, 0.0  ;;  %v139_v24 = vadd.f32 %v304_v2, %v86_v9  ;;  %v50_v4 = vld [vmem:[%s695_s0 + $0x120] sm:$0xff]  ;;  %v51_v8 = vld [vmem:[%s695_s0 + $0x128] sm:$0xff] }
  0x12   :  { %227 = vst [vmem:[%s698_s3 + $0x48] sm:$0xff] %v178_v60  ;;  %v90_v25 = vmul.f32 %v299_v1, %v37_v14  ;;  %v185_v27 = vmax.f32 %v136_v12, 0.0  ;;  %v140_v28 = vadd.f32 %v304_v2, %v87_v13  ;;  %v91_v29 = vmul.f32 %v299_v1, %v38_v18  ;;  %v52_v12 = vld [vmem:[%s695_s0 + $0x130] sm:$0xff] }
  0x13   :  { %228 = vst [vmem:[%s698_s3 + $0x50] sm:$0xff] %v179_v63  ;;  %v186_v31 = vmax.f32 %v137_v16, 0.0  ;;  %v141_v32 = vadd.f32 %v304_v2, %v88_v17  ;;  %v92_v33 = vmul.f32 %v299_v1, %v39_v22  ;;  %v187_v35 = vmax.f32 %v138_v20, 0.0  ;;  %v53_v16 = vld [vmem:[%s695_s0 + $0x138] sm:$0xff]  ;;  %v54_v20 = vld [vmem:[%s695_s0 + $0x140] sm:$0xff] }
  0x14   :  { %229 = vst [vmem:[%s698_s3 + $0x58] sm:$0xff] %v180_v6  ;;  %v142_v36 = vadd.f32 %v304_v2, %v89_v21  ;;  %v93_v37 = vmul.f32 %v299_v1, %v40_v26  ;;  %v188_v39 = vmax.f32 %v139_v24, 0.0  ;;  %v143_v40 = vadd.f32 %v304_v2, %v90_v25  ;;  %v55_v24 = vld [vmem:[%s695_s0 + $0x148] sm:$0xff] }
  0x15   :  { %230 = vst [vmem:[%s698_s3 + $0x60] sm:$0xff] %v181_v11  ;;  %v94_v41 = vmul.f32 %v299_v1, %v41_v30  ;;  %v189_v43 = vmax.f32 %v140_v28, 0.0  ;;  %v144_v44 = vadd.f32 %v304_v2, %v91_v29  ;;  %v95_v45 = vmul.f32 %v299_v1, %v42_v34  ;;  %v56_v28 = vld [vmem:[%s695_s0 + $0x150] sm:$0xff] }
  0x16   :  { %231 = vst [vmem:[%s698_s3 + $0x68] sm:$0xff] %v182_v15  ;;  %v190_v47 = vmax.f32 %v141_v32, 0.0  ;;  %v145_v48 = vadd.f32 %v304_v2, %v92_v33  ;;  %v96_v49 = vmul.f32 %v299_v1, %v43_v38  ;;  %v191_v51 = vmax.f32 %v142_v36, 0.0  ;;  %v57_v32 = vld [vmem:[%s695_s0 + $0x158] sm:$0xff]  ;;  %v58_v36 = vld [vmem:[%s695_s0 + $0x160] sm:$0xff] }
  0x17   :  { %232 = vst [vmem:[%s698_s3 + $0x70] sm:$0xff] %v183_v19  ;;  %v146_v52 = vadd.f32 %v304_v2, %v93_v37  ;;  %v97_v53 = vmul.f32 %v299_v1, %v44_v42  ;;  %v192_v55 = vmax.f32 %v143_v40, 0.0  ;;  %v147_v56 = vadd.f32 %v304_v2, %v94_v41  ;;  %v59_v40 = vld [vmem:[%s695_s0 + $0x168] sm:$0xff] }
  0x18   :  { %233 = vst [vmem:[%s698_s3 + $0x78] sm:$0xff] %v184_v23  ;;  %v98_v57 = vmul.f32 %v299_v1, %v45_v46  ;;  %v193_v59 = vmax.f32 %v144_v44, 0.0  ;;  %v148_v60 = vadd.f32 %v304_v2, %v95_v45  ;;  %v99_v61 = vmul.f32 %v299_v1, %v46_v50  ;;  %v60_v44 = vld [vmem:[%s695_s0 + $0x170] sm:$0xff] }
  0x19   :  { %234 = vst [vmem:[%s698_s3 + $0x80] sm:$0xff] %v185_v27  ;;  %v194_v63 = vmax.f32 %v145_v48, 0.0  ;;  %v149_v0 = vadd.f32 %v304_v2, %v96_v49  ;;  %v100_v3 = vmul.f32 %v299_v1, %v47_v54  ;;  %v195_v5 = vmax.f32 %v146_v52, 0.0  ;;  %v61_v48 = vld [vmem:[%s695_s0 + $0x178] sm:$0xff]  ;;  %v62_v52 = vld [vmem:[%s695_s0 + $0x180] sm:$0xff] }
  0x1a   :  { %235 = vst [vmem:[%s698_s3 + $0x88] sm:$0xff] %v186_v31  ;;  %v150_v6 = vadd.f32 %v304_v2, %v97_v53  ;;  %v101_v7 = vmul.f32 %v299_v1, %v48_v58  ;;  %v196_v9 = vmax.f32 %v147_v56, 0.0  ;;  %v151_v10 = vadd.f32 %v304_v2, %v98_v57 }
  0x1b   :  { %236 = vst [vmem:[%s698_s3 + $0x90] sm:$0xff] %v187_v35  ;;  %v102_v11 = vmul.f32 %v299_v1, %v49_v62  ;;  %v197_v13 = vmax.f32 %v148_v60, 0.0  ;;  %v152_v14 = vadd.f32 %v304_v2, %v99_v61  ;;  %v103_v15 = vmul.f32 %v299_v1, %v50_v4 }
  0x1c   :  { %237 = vst [vmem:[%s698_s3 + $0x98] sm:$0xff] %v188_v39  ;;  %v198_v17 = vmax.f32 %v149_v0, 0.0  ;;  %v153_v18 = vadd.f32 %v304_v2, %v100_v3  ;;  %v104_v19 = vmul.f32 %v299_v1, %v51_v8  ;;  %v199_v21 = vmax.f32 %v150_v6, 0.0 }
  0x1d   :  { %238 = vst [vmem:[%s698_s3 + $0xa0] sm:$0xff] %v189_v43  ;;  %v154_v22 = vadd.f32 %v304_v2, %v101_v7  ;;  %v105_v23 = vmul.f32 %v299_v1, %v52_v12  ;;  %v200_v25 = vmax.f32 %v151_v10, 0.0  ;;  %v155_v26 = vadd.f32 %v304_v2, %v102_v11 }
  0x1e   :  { %239 = vst [vmem:[%s698_s3 + $0xa8] sm:$0xff] %v190_v47  ;;  %v106_v27 = vmul.f32 %v299_v1, %v53_v16  ;;  %v201_v29 = vmax.f32 %v152_v14, 0.0  ;;  %v156_v30 = vadd.f32 %v304_v2, %v103_v15  ;;  %v107_v31 = vmul.f32 %v299_v1, %v54_v20 }
  0x1f   :  { %240 = vst [vmem:[%s698_s3 + $0xb0] sm:$0xff] %v191_v51  ;;  %v202_v33 = vmax.f32 %v153_v18, 0.0  ;;  %v157_v34 = vadd.f32 %v304_v2, %v104_v19  ;;  %v108_v35 = vmul.f32 %v299_v1, %v55_v24  ;;  %v203_v37 = vmax.f32 %v154_v22, 0.0 }
  0x20   :  { %241 = vst [vmem:[%s698_s3 + $0xb8] sm:$0xff] %v192_v55  ;;  %v158_v38 = vadd.f32 %v304_v2, %v105_v23  ;;  %v109_v39 = vmul.f32 %v299_v1, %v56_v28  ;;  %v204_v41 = vmax.f32 %v155_v26, 0.0  ;;  %v159_v42 = vadd.f32 %v304_v2, %v106_v27 }
  0x21   :  { %242 = vst [vmem:[%s698_s3 + $0xc0] sm:$0xff] %v193_v59  ;;  %v110_v43 = vmul.f32 %v299_v1, %v57_v32  ;;  %v205_v45 = vmax.f32 %v156_v30, 0.0  ;;  %v160_v46 = vadd.f32 %v304_v2, %v107_v31  ;;  %v111_v47 = vmul.f32 %v299_v1, %v58_v36 }
  0x22   :  { %243 = vst [vmem:[%s698_s3 + $0xc8] sm:$0xff] %v194_v63  ;;  %v206_v49 = vmax.f32 %v157_v34, 0.0  ;;  %v161_v50 = vadd.f32 %v304_v2, %v108_v35  ;;  %v112_v51 = vmul.f32 %v299_v1, %v59_v40  ;;  %v207_v53 = vmax.f32 %v158_v38, 0.0 }
  0x23   :  { %244 = vst [vmem:[%s698_s3 + $0xd0] sm:$0xff] %v195_v5  ;;  %v162_v54 = vadd.f32 %v304_v2, %v109_v39  ;;  %v113_v55 = vmul.f32 %v299_v1, %v60_v44  ;;  %v208_v56 = vmax.f32 %v159_v42, 0.0  ;;  %v163_v57 = vadd.f32 %v304_v2, %v110_v43 }
  0x24   :  { %245 = vst [vmem:[%s698_s3 + $0xd8] sm:$0xff] %v196_v9  ;;  %v114_v58 = vmul.f32 %v299_v1, %v61_v48  ;;  %v209_v59 = vmax.f32 %v160_v46, 0.0  ;;  %v164_v60 = vadd.f32 %v304_v2, %v111_v47  ;;  %v115_v61 = vmul.f32 %v299_v1, %v62_v52 }
  0x25   :  { %246 = vst [vmem:[%s698_s3 + $0xe0] sm:$0xff] %v197_v13  ;;  %v210_v62 = vmax.f32 %v161_v50, 0.0  ;;  %v165_v63 = vadd.f32 %v304_v2, %v112_v51  ;;  %v211_v0 = vmax.f32 %v162_v54, 0.0  ;;  %v166_v3 = vadd.f32 %v304_v2, %v113_v55 }
  0x26   :  { %247 = vst [vmem:[%s698_s3 + $0xe8] sm:$0xff] %v198_v17  ;;  %v212_v4 = vmax.f32 %v163_v57, 0.0  ;;  %v167_v1 = vadd.f32 %v304_v2, %v114_v58  ;;  %v213_v5 = vmax.f32 %v164_v60, 0.0  ;;  %v168_v6 = vadd.f32 %v304_v2, %v115_v61 }
  0x27   :  { %248 = vst [vmem:[%s698_s3 + $0xf0] sm:$0xff] %v199_v21  ;;  %v214_v7 = vmax.f32 %v165_v63, 0.0  ;;  %v215_v8 = vmax.f32 %v166_v3, 0.0 }
  0x28   :  { %249 = vst [vmem:[%s698_s3 + $0xf8] sm:$0xff] %v200_v25  ;;  %v216_v9 = vmax.f32 %v167_v1, 0.0  ;;  %v217_v2 = vmax.f32 %v168_v6, 0.0 }
  0x29   :  { %250 = vst [vmem:[%s698_s3 + $0x100] sm:$0xff] %v201_v29 }
  0x2a   :  { %251 = vst [vmem:[%s698_s3 + $0x108] sm:$0xff] %v202_v33 }
  0x2b   :  { %252 = vst [vmem:[%s698_s3 + $0x110] sm:$0xff] %v203_v37 }
  0x2c   :  { %253 = vst [vmem:[%s698_s3 + $0x118] sm:$0xff] %v204_v41 }
  0x2d   :  { %254 = vst [vmem:[%s698_s3 + $0x120] sm:$0xff] %v205_v45 }
  0x2e   :  { %255 = vst [vmem:[%s698_s3 + $0x128] sm:$0xff] %v206_v49 }
  0x2f   :  { %256 = vst [vmem:[%s698_s3 + $0x130] sm:$0xff] %v207_v53 }
  0x30   :  { %257 = vst [vmem:[%s698_s3 + $0x138] sm:$0xff] %v208_v56 }
  0x31   :  { %258 = vst [vmem:[%s698_s3 + $0x140] sm:$0xff] %v209_v59 }
  0x32   :  { %259 = vst [vmem:[%s698_s3 + $0x148] sm:$0xff] %v210_v62 }
  0x33   :  { %260 = vst [vmem:[%s698_s3 + $0x150] sm:$0xff] %v211_v0 }
  0x34   :  { %261 = vst [vmem:[%s698_s3 + $0x158] sm:$0xff] %v212_v4 }
  0x35   :  { %262 = vst [vmem:[%s698_s3 + $0x160] sm:$0xff] %v213_v5 }
  0x36   :  { %263 = vst [vmem:[%s698_s3 + $0x168] sm:$0xff] %v214_v7 }
  0x37   :  { %264 = vst [vmem:[%s698_s3 + $0x170] sm:$0xff] %v215_v8 }
  0x38   :  { %265 = vst [vmem:[%s698_s3 + $0x178] sm:$0xff] %v216_v9 }
  0x39   :  { %266 = vst [vmem:[%s698_s3 + $0x180] sm:$0xff] %v217_v2 }

// kernel: conv_bn_relu.2
= control target key start
LH: loop header
LB: loop body
LE: loop exit
PB: predicated region body
PF: predicated region fallthrough
CT: control target
= control target key end

     0   :  { %vm216_vm0 = vcmask 1043456   ;;  %vm68_vm1 = vcmask 293888   ;;  %s1256_s1 = inlined_call_operand.vmem [shape: f32[36,128], index: 1, kind: input, shape index: {}]   ;;  %s1257_s0 = inlined_call_operand.vmem [shape: f32[392,36], index: 0, kind: input, shape index: {}]   ;;  %s1258_s2 = inlined_call_operand.vmem [shape: f32[392,128], index: 2, kind: output, shape index: {0}]   ;;  %s1259_s3 = inlined_call_operand.vmem [shape: f32[1,8,128], index: 3, kind: output, shape index: {1}]   ;;  %s1260_s4 = inlined_call_operand.vmem [shape: f32[1,8,128], index: 4, kind: output, shape index: {2}]  }
   0x1   :  { %v67_v0 = vld [vmem:[%s1256_s1 + $0x20] sm:$0xf]  ;;  %v66_v1 = vld [vmem:[%s1256_s1 + $0x18] sm:$0xff]  ;;  %v65_v2 = vld [vmem:[%s1256_s1 + $0x10] sm:$0xff] }
   0x2   :  { %604 = vmatpush.msk.msra.mxu0 %vm216_vm0, %v67_v0  ;;  %654 = vmatpush.msk.msra.mxu1 %vm216_vm0, %v67_v0  ;;  %v64_v3 = vld [vmem:[%s1256_s1 + $0x8] sm:$0xff]  ;;  %v63_v4 = vld [vmem:[%s1256_s1] sm:$0xff]  ;;  %v16_v11 = vld [vmem:[%s1257_s0 + $0x10] sm:$0xff] }
   0x3   :  { %655 = vmatpush.msk.msra.mxu2 %vm216_vm0, %v67_v0  ;;  %656 = vmatpush.msk.msra.mxu3 %vm216_vm0, %v67_v0  ;;  %v14_v5 = vld [vmem:[%s1257_s0] sm:$0xff]  ;;  %v15_v8 = vld [vmem:[%s1257_s0 + $0x8] sm:$0xff]  ;;  %v28_v12 = vld [vmem:[%s1257_s0 + $0x70] sm:$0xff] }
   0x4   :  { %232 = vmatpush.msra.mxu0 %v66_v1  ;;  %657 = vmatpush.msra.mxu1 %v66_v1  ;;  %v26_v6 = vld [vmem:[%s1257_s0 + $0x60] sm:$0xff]  ;;  %v27_v9 = vld [vmem:[%s1257_s0 + $0x68] sm:$0xff]  ;;  %v40_v13 = vld [vmem:[%s1257_s0 + $0xd0] sm:$0xff] }
   0x5   :  { %658 = vmatpush.msra.mxu2 %v66_v1  ;;  %659 = vmatpush.msra.mxu3 %v66_v1  ;;  %v38_v7 = vld [vmem:[%s1257_s0 + $0xc0] sm:$0xff]  ;;  %v39_v10 = vld [vmem:[%s1257_s0 + $0xc8] sm:$0xff]  ;;  %v17_v14 = vld [vmem:[%s1257_s0 + $0x18] sm:$0xff] }
   0x6   :  { %233 = vmatpush.msra.mxu0 %v65_v2  ;;  %660 = vmatpush.msra.mxu1 %v65_v2  ;;  %v29_v15 = vld [vmem:[%s1257_s0 + $0x78] sm:$0xff]  ;;  %v18_v17 = vld [vmem:[%s1257_s0 + $0x20] sm:$0xff]  ;;  %v51_v20 = vld [vmem:[%s1257_s0 + $0x128] sm:$0xff] }
   0x7   :  { %661 = vmatpush.msra.mxu2 %v65_v2  ;;  %662 = vmatpush.msra.mxu3 %v65_v2  ;;  %v41_v16 = vld [vmem:[%s1257_s0 + $0xd8] sm:$0xff]  ;;  %v30_v18 = vld [vmem:[%s1257_s0 + $0x80] sm:$0xff]  ;;  %v19_v21 = vld [vmem:[%s1257_s0 + $0x28] sm:$0xff] }
   0x8   :  { %234 = vmatpush.msra.mxu0 %v64_v3  ;;  %663 = vmatpush.msra.mxu1 %v64_v3  ;;  %v42_v19 = vld [vmem:[%s1257_s0 + $0xe0] sm:$0xff]  ;;  %v31_v22 = vld [vmem:[%s1257_s0 + $0x88] sm:$0xff]  ;;  %v52_v24 = vld [vmem:[%s1257_s0 + $0x130] sm:$0xff] }
   0x9   :  { %664 = vmatpush.msra.mxu2 %v64_v3  ;;  %665 = vmatpush.msra.mxu3 %v64_v3  ;;  %v43_v23 = vld [vmem:[%s1257_s0 + $0xe8] sm:$0xff]  ;;  %v20_v25 = vld [vmem:[%s1257_s0 + $0x30] sm:$0xff]  ;;  %v53_v28 = vld [vmem:[%s1257_s0 + $0x138] sm:$0xff] }
   0xa   :  { %235 = vmatpush.msra.mxu0 %v63_v4  ;;  %666 = vmatpush.msra.mxu1 %v63_v4  ;;  %v32_v26 = vld [vmem:[%s1257_s0 + $0x90] sm:$0xff]  ;;  %v21_v29 = vld [vmem:[%s1257_s0 + $0x38] sm:$0xff]  ;;  %v54_v32 = vld [vmem:[%s1257_s0 + $0x140] sm:$0xff] }
   0xb   :  { %605 = vmatmul.msk.f32.vlgmr.msra.gmra.mxu0 %vm68_vm1, %v14_v5  ;;  %617 = vmatmul.msk.f32.vlgmr.msra.gmra.mxu1 %vm68_vm1, %v26_v6  ;;  %v44_v27 = vld [vmem:[%s1257_s0 + $0xf0] sm:$0xff]  ;;  %v33_v30 = vld [vmem:[%s1257_s0 + $0x98] sm:$0xff]  ;;  %v22_v33 = vld [vmem:[%s1257_s0 + $0x40] sm:$0xff] }
   0xc   :  { %667 = vmatpush.msra.mxu2 %v63_v4  ;;  %668 = vmatpush.msra.mxu3 %v63_v4  ;;  %v45_v31 = vld [vmem:[%s1257_s0 + $0xf8] sm:$0xff]  ;;  %v34_v34 = vld [vmem:[%s1257_s0 + $0xa0] sm:$0xff]  ;;  %v55_v35 = vld [vmem:[%s1257_s0 + $0x148] sm:$0xff] }
   0xd   :  { %629 = vmatmul.msk.f32.vlgmr.msra.gmra.mxu2 %vm68_vm1, %v38_v7  ;;  %642 = vmatmul.msk.f32.vlgmr.msra.gmra.mxu3 %vm68_vm1, %v51_v20  ;;  %v46_v36 = vld [vmem:[%s1257_s0 + $0x100] sm:$0xff]  ;;  %v23_v37 = vld [vmem:[%s1257_s0 + $0x48] sm:$0xff]  ;;  %v56_v39 = vld [vmem:[%s1257_s0 + $0x150] sm:$0xff] }
   0xe   :  { %v35_v38 = vld [vmem:[%s1257_s0 + $0xa8] sm:$0xff]  ;;  %v24_v41 = vld [vmem:[%s1257_s0 + $0x50] sm:$0xff]  ;;  %v57_v43 = vld [vmem:[%s1257_s0 + $0x158] sm:$0xff] }
   0xf   :  { %v47_v40 = vld [vmem:[%s1257_s0 + $0x108] sm:$0xff]  ;;  %v36_v42 = vld [vmem:[%s1257_s0 + $0xb0] sm:$0xff]  ;;  %v25_v45 = vld [vmem:[%s1257_s0 + $0x58] sm:$0xff] }
  0x10   :  { %v48_v44 = vld [vmem:[%s1257_s0 + $0x110] sm:$0xff]  ;;  %v37_v46 = vld [vmem:[%s1257_s0 + $0xb8] sm:$0xff]  ;;  %v58_v47 = vld [vmem:[%s1257_s0 + $0x160] sm:$0xff] }
  0x11   :  { %v49_v48 = vld [vmem:[%s1257_s0 + $0x118] sm:$0xff]  ;;  %v59_v49 = vld [vmem:[%s1257_s0 + $0x168] sm:$0xff]  ;;  %v50_v50 = vld [vmem:[%s1257_s0 + $0x120] sm:$0xff] }
  0x12   :  { %v60_v51 = vld [vmem:[%s1257_s0 + $0x170] sm:$0xff]  ;;  %v61_v52 = vld [vmem:[%s1257_s0 + $0x178] sm:$0xff]  ;;  %v62_v53 = vld [vmem:[%s1257_s0 + $0x180] sm:$0xff] }
  0x13   :  { %606 = vmatmul.msk.f32.gmra.mxu0 %vm68_vm1, %v15_v8  ;;  %618 = vmatmul.msk.f32.gmra.mxu1 %vm68_vm1, %v27_v9 }
  0x15   :  { %630 = vmatmul.msk.f32.gmra.mxu2 %vm68_vm1, %v39_v10  ;;  %643 = vmatmul.msk.f32.gmra.mxu3 %vm68_vm1, %v52_v24 }
  0x1b   :  { %607 = vmatmul.msk.f32.gmra.mxu0 %vm68_vm1, %v16_v11  ;;  %619 = vmatmul.msk.f32.gmra.mxu1 %vm68_vm1, %v28_v12 }
  0x1d   :  { %631 = vmatmul.msk.f32.gmra.mxu2 %vm68_vm1, %v40_v13  ;;  %644 = vmatmul.msk.f32.gmra.mxu3 %vm68_vm1, %v53_v28 }
  0x23   :  { %608 = vmatmul.msk.f32.gmra.mxu0 %vm68_vm1, %v17_v14  ;;  %620 = vmatmul.msk.f32.gmra.mxu1 %vm68_vm1, %v29_v15 }
  0x25   :  { %632 = vmatmul.msk.f32.gmra.mxu2 %vm68_vm1, %v41_v16  ;;  %645 = vmatmul.msk.f32.gmra.mxu3 %vm68_vm1, %v54_v32 }
  0x2b   :  { %609 = vmatmul.msk.f32.gmra.mxu0 %vm68_vm1, %v18_v17  ;;  %621 = vmatmul.msk.f32.gmra.mxu1 %vm68_vm1, %v30_v18 }
  0x2d   :  { %633 = vmatmul.msk.f32.gmra.mxu2 %vm68_vm1, %v42_v19  ;;  %646 = vmatmul.msk.f32.gmra.mxu3 %vm68_vm1, %v55_v35 }
  0x33   :  { %610 = vmatmul.msk.f32.gmra.mxu0 %vm68_vm1, %v19_v21  ;;  %622 = vmatmul.msk.f32.gmra.mxu1 %vm68_vm1, %v31_v22 }
  0x35   :  { %634 = vmatmul.msk.f32.gmra.mxu2 %vm68_vm1, %v43_v23  ;;  %647 = vmatmul.msk.f32.gmra.mxu3 %vm68_vm1, %v56_v39 }
  0x3b   :  { %611 = vmatmul.msk.f32.gmra.mxu0 %vm68_vm1, %v20_v25  ;;  %623 = vmatmul.msk.f32.gmra.mxu1 %vm68_vm1, %v32_v26 }
  0x3d   :  { %635 = vmatmul.msk.f32.gmra.mxu2 %vm68_vm1, %v44_v27  ;;  %648 = vmatmul.msk.f32.gmra.mxu3 %vm68_vm1, %v57_v43 }
  0x43   :  { %612 = vmatmul.msk.f32.gmra.mxu0 %vm68_vm1, %v21_v29  ;;  %624 = vmatmul.msk.f32.gmra.mxu1 %vm68_vm1, %v33_v30 }
  0x45   :  { %636 = vmatmul.msk.f32.gmra.mxu2 %vm68_vm1, %v45_v31  ;;  %649 = vmatmul.msk.f32.gmra.mxu3 %vm68_vm1, %v58_v47 }
  0x4b   :  { %613 = vmatmul.msk.f32.gmra.mxu0 %vm68_vm1, %v22_v33  ;;  %625 = vmatmul.msk.f32.gmra.mxu1 %vm68_vm1, %v34_v34 }
  0x4d   :  { %637 = vmatmul.msk.f32.gmra.mxu2 %vm68_vm1, %v46_v36  ;;  %650 = vmatmul.msk.f32.gmra.mxu3 %vm68_vm1, %v59_v49 }
  0x53   :  { %614 = vmatmul.msk.f32.gmra.mxu0 %vm68_vm1, %v23_v37  ;;  %626 = vmatmul.msk.f32.gmra.mxu1 %vm68_vm1, %v35_v38 }
  0x55   :  { %638 = vmatmul.msk.f32.gmra.mxu2 %vm68_vm1, %v47_v40  ;;  %651 = vmatmul.msk.f32.gmra.mxu3 %vm68_vm1, %v60_v51 }
  0x5b   :  { %615 = vmatmul.msk.f32.gmra.mxu0 %vm68_vm1, %v24_v41  ;;  %627 = vmatmul.msk.f32.gmra.mxu1 %vm68_vm1, %v36_v42 }
  0x5d   :  { %639 = vmatmul.msk.f32.gmra.mxu2 %vm68_vm1, %v48_v44  ;;  %652 = vmatmul.msk.f32.gmra.mxu3 %vm68_vm1, %v61_v52 }
  0x63   :  { %616 = vmatmul.msk.f32.gmra.mxu0 %vm68_vm1, %v25_v45  ;;  %628 = vmatmul.msk.f32.gmra.mxu1 %vm68_vm1, %v37_v46 }
  0x65   :  { %640 = vmatmul.msk.f32.gmra.mxu2 %vm68_vm1, %v49_v48  ;;  %653 = vmatmul.msk.f32.gmra.mxu3 %vm68_vm1, %v62_v53 }
  0x6d   :  { %641 = vmatmul.msk.f32.gmra.mxu2 %vm68_vm1, %v50_v50 }
  0x88   :  { %v237_v54 = vpop.f32.mrf.mxu0  ;;  %v905_v55 = vpop.f32.mrf.mxu1 }
  0x89   :  { %384 = vst [vmem:[%s1258_s2] sm:$0xff] %v237_v54  ;;  %v487_v21 = vmul.f32 %v237_v54, %v237_v54 }
  0x8a   :  { %396 = vst [vmem:[%s1258_s2 + $0x60] sm:$0xff] %v905_v55 }
  0x90   :  { %v240_v56 = vpop.f32.mrf.mxu0  ;;  %v914_v57 = vpop.f32.mrf.mxu1 }
  0x91   :  { %385 = vst [vmem:[%s1258_s2 + $0x8] sm:$0xff] %v240_v56  ;;  %v923_v58 = vpop.f32.mrf.mxu2  ;;  %v985_v7 = vpop.f32.mrf.mxu3  ;;  %v488_v20 = vmul.f32 %v240_v56, %v240_v56  ;;  %v433_v22 = vadd.f32 %v240_v56, %v237_v54 }
  0x92   :  { %397 = vst [vmem:[%s1258_s2 + $0x68] sm:$0xff] %v914_v57 }
  0x93   :  { %408 = vst [vmem:[%s1258_s2 + $0xc0] sm:$0xff] %v923_v58  ;;  %v536_v24 = vadd.f32 %v488_v20, %v487_v21 }
  0x94   :  { %421 = vst [vmem:[%s1258_s2 + $0x128] sm:$0xff] %v985_v7 }
  0x98   :  { %v243_v59 = vpop.f32.mrf.mxu0  ;;  %v929_v60 = vpop.f32.mrf.mxu1 }
  0x99   :  { %386 = vst [vmem:[%s1258_s2 + $0x10] sm:$0xff] %v243_v59  ;;  %v938_v61 = vpop.f32.mrf.mxu2  ;;  %v1006_v11 = vpop.f32.mrf.mxu3  ;;  %v489_v23 = vmul.f32 %v243_v59, %v243_v59  ;;  %v434_v25 = vadd.f32 %v433_v22, %v243_v59  ;;  %v499_v22 = vmul.f32 %v905_v55, %v905_v55 }
  0x9a   :  { %398 = vst [vmem:[%s1258_s2 + $0x70] sm:$0xff] %v929_v60 }
  0x9b   :  { %409 = vst [vmem:[%s1258_s2 + $0xc8] sm:$0xff] %v938_v61  ;;  %v537_v29 = vadd.f32 %v536_v24, %v489_v23 }
  0x9c   :  { %422 = vst [vmem:[%s1258_s2 + $0x130] sm:$0xff] %v1006_v11 }
  0xa0   :  { %v246_v62 = vpop.f32.mrf.mxu0  ;;  %v944_v63 = vpop.f32.mrf.mxu1 }
  0xa1   :  { %387 = vst [vmem:[%s1258_s2 + $0x18] sm:$0xff] %v246_v62  ;;  %v953_v0 = vpop.f32.mrf.mxu2  ;;  %v1027_v15 = vpop.f32.mrf.mxu3  ;;  %v490_v26 = vmul.f32 %v246_v62, %v246_v62  ;;  %v435_v30 = vadd.f32 %v434_v25, %v246_v62  ;;  %v500_v25 = vmul.f32 %v914_v57, %v914_v57 }
  0xa2   :  { %399 = vst [vmem:[%s1258_s2 + $0x78] sm:$0xff] %v944_v63 }
  0xa3   :  { %410 = vst [vmem:[%s1258_s2 + $0xd0] sm:$0xff] %v953_v0  ;;  %v538_v34 = vadd.f32 %v537_v29, %v490_v26 }
  0xa4   :  { %423 = vst [vmem:[%s1258_s2 + $0x138] sm:$0xff] %v1027_v15 }
  0xa8   :  { %v249_v1 = vpop.f32.mrf.mxu0  ;;  %v959_v2 = vpop.f32.mrf.mxu1 }
  0xa9   :  { %388 = vst [vmem:[%s1258_s2 + $0x20] sm:$0xff] %v249_v1  ;;  %v968_v3 = vpop.f32.mrf.mxu2  ;;  %v1048_v19 = vpop.f32.mrf.mxu3  ;;  %v491_v31 = vmul.f32 %v249_v1, %v249_v1  ;;  %v436_v35 = vadd.f32 %v435_v30, %v249_v1 }
  0xaa   :  { %400 = vst [vmem:[%s1258_s2 + $0x80] sm:$0xff] %v959_v2 }
  0xab   :  { %411 = vst [vmem:[%s1258_s2 + $0xd8] sm:$0xff] %v968_v3  ;;  %v539_v37 = vadd.f32 %v538_v34, %v491_v31  ;;  %v502_v31 = vmul.f32 %v944_v63, %v944_v63 }
  0xac   :  { %424 = vst [vmem:[%s1258_s2 + $0x140] sm:$0xff] %v1048_v19 }
  0xb0   :  { %v252_v4 = vpop.f32.mrf.mxu0  ;;  %v974_v5 = vpop.f32.mrf.mxu1 }
  0xb1   :  { %389 = vst [vmem:[%s1258_s2 + $0x28] sm:$0xff] %v252_v4  ;;  %v983_v6 = vpop.f32.mrf.mxu2  ;;  %v1069_v33 = vpop.f32.mrf.mxu3  ;;  %v492_v36 = vmul.f32 %v252_v4, %v252_v4  ;;  %v437_v38 = vadd.f32 %v436_v35, %v252_v4 }
  0xb2   :  { %401 = vst [vmem:[%s1258_s2 + $0x88] sm:$0xff] %v974_v5 }
  0xb3   :  { %412 = vst [vmem:[%s1258_s2 + $0xe0] sm:$0xff] %v983_v6  ;;  %v540_v40 = vadd.f32 %v539_v37, %v492_v36 }
  0xb4   :  { %425 = vst [vmem:[%s1258_s2 + $0x148] sm:$0xff] %v1069_v33 }
  0xb8   :  { %v255_v8 = vpop.f32.mrf.mxu0  ;;  %v995_v9 = vpop.f32.mrf.mxu1 }
  0xb9   :  { %390 = vst [vmem:[%s1258_s2 + $0x30] sm:$0xff] %v255_v8  ;;  %v1004_v10 = vpop.f32.mrf.mxu2  ;;  %v493_v39 = vmul.f32 %v255_v8, %v255_v8  ;;  %v438_v41 = vadd.f32 %v437_v38, %v255_v8  ;;  %v1090_v49 = vpop.f32.mrf.mxu3 }
  0xba   :  { %402 = vst [vmem:[%s1258_s2 + $0x90] sm:$0xff] %v995_v9 }
  0xbb   :  { %413 = vst [vmem:[%s1258_s2 + $0xe8] sm:$0xff] %v1004_v10  ;;  %v541_v45 = vadd.f32 %v540_v40, %v493_v39 }
  0xbc   :  { %426 = vst [vmem:[%s1258_s2 + $0x150] sm:$0xff] %v1090_v49 }
  0xc0   :  { %v258_v12 = vpop.f32.mrf.mxu0  ;;  %v1016_v13 = vpop.f32.mrf.mxu1 }
  0xc1   :  { %391 = vst [vmem:[%s1258_s2 + $0x38] sm:$0xff] %v258_v12  ;;  %v1025_v14 = vpop.f32.mrf.mxu2  ;;  %v494_v42 = vmul.f32 %v258_v12, %v258_v12  ;;  %v439_v46 = vadd.f32 %v438_v41, %v258_v12  ;;  %v1108_v21 = vpop.f32.mrf.mxu3  ;;  %v505_v41 = vmul.f32 %v995_v9, %v995_v9 }
  0xc2   :  { %403 = vst [vmem:[%s1258_s2 + $0x98] sm:$0xff] %v1016_v13 }
  0xc3   :  { %414 = vst [vmem:[%s1258_s2 + $0xf0] sm:$0xff] %v1025_v14  ;;  %v542_v50 = vadd.f32 %v541_v45, %v494_v42 }
  0xc4   :  { %427 = vst [vmem:[%s1258_s2 + $0x158] sm:$0xff] %v1108_v21 }
  0xc8   :  { %v261_v16 = vpop.f32.mrf.mxu0  ;;  %v1037_v17 = vpop.f32.mrf.mxu1 }
  0xc9   :  { %392 = vst [vmem:[%s1258_s2 + $0x40] sm:$0xff] %v261_v16  ;;  %v1046_v18 = vpop.f32.mrf.mxu2  ;;  %v495_v47 = vmul.f32 %v261_v16, %v261_v16  ;;  %v440_v51 = vadd.f32 %v439_v46, %v261_v16  ;;  %v1132_v37 = vpop.f32.mrf.mxu3 }
  0xca   :  { %404 = vst [vmem:[%s1258_s2 + $0xa0] sm:$0xff] %v1037_v17 }
  0xcb   :  { %415 = vst [vmem:[%s1258_s2 + $0xf8] sm:$0xff] %v1046_v18  ;;  %v543_v53 = vadd.f32 %v542_v50, %v495_v47 }
  0xcc   :  { %428 = vst [vmem:[%s1258_s2 + $0x160] sm:$0xff] %v1132_v37 }
  0xd0   :  { %v264_v27 = vpop.f32.mrf.mxu0  ;;  %v1058_v28 = vpop.f32.mrf.mxu1 }
  0xd1   :  { %393 = vst [vmem:[%s1258_s2 + $0x48] sm:$0xff] %v264_v27  ;;  %v1067_v32 = vpop.f32.mrf.mxu2  ;;  %v496_v52 = vmul.f32 %v264_v27, %v264_v27  ;;  %v441_v54 = vadd.f32 %v440_v51, %v264_v27  ;;  %v1154_v50 = vpop.f32.mrf.mxu3 }
  0xd2   :  { %405 = vst [vmem:[%s1258_s2 + $0xa8] sm:$0xff] %v1058_v28 }
  0xd3   :  { %416 = vst [vmem:[%s1258_s2 + $0x100] sm:$0xff] %v1067_v32  ;;  %v544_v59 = vadd.f32 %v543_v53, %v496_v52  ;;  %v508_v53 = vmul.f32 %v1058_v28, %v1058_v28 }
  0xd4   :  { %429 = vst [vmem:[%s1258_s2 + $0x168] sm:$0xff] %v1154_v50 }
  0xd8   :  { %v267_v43 = vpop.f32.mrf.mxu0  ;;  %v1079_v44 = vpop.f32.mrf.mxu1 }
  0xd9   :  { %394 = vst [vmem:[%s1258_s2 + $0x50] sm:$0xff] %v267_v43  ;;  %v1088_v48 = vpop.f32.mrf.mxu2  ;;  %v497_v56 = vmul.f32 %v267_v43, %v267_v43  ;;  %v442_v62 = vadd.f32 %v441_v54, %v267_v43  ;;  %v506_v43 = vmul.f32 %v1016_v13, %v1016_v13 }
  0xda   :  { %406 = vst [vmem:[%s1258_s2 + $0xb0] sm:$0xff] %v1079_v44 }
  0xdb   :  { %417 = vst [vmem:[%s1258_s2 + $0x108] sm:$0xff] %v1088_v48  ;;  %v545_v8 = vadd.f32 %v544_v59, %v497_v56 }
  0xe0   :  { %v270_v1 = vpop.f32.mrf.mxu0  ;;  %v306_v4 = vpop.f32.mrf.mxu1 }
  0xe1   :  { %395 = vst [vmem:[%s1258_s2 + $0x58] sm:$0xff] %v270_v1  ;;  %v443_v12 = vadd.f32 %v442_v62, %v270_v1  ;;  %v498_v16 = vmul.f32 %v270_v1, %v270_v1  ;;  %v1106_v20 = vpop.f32.mrf.mxu2  ;;  %v510_v59 = vmul.f32 %v306_v4, %v306_v4 }
  0xe2   :  { %407 = vst [vmem:[%s1258_s2 + $0xb8] sm:$0xff] %v306_v4 }
  0xe3   :  { %v444_v23 = vadd.f32 %v443_v12, %v905_v55  ;;  %v546_v24 = vadd.f32 %v545_v8, %v498_v16  ;;  %418 = vst [vmem:[%s1258_s2 + $0x110] sm:$0xff] %v1106_v20  ;;  %v501_v55 = vmul.f32 %v929_v60, %v929_v60  ;;  %v1172_v8 = vpop.f32.mrf.mxu3  ;;  %v511_v12 = vmul.f32 %v923_v58, %v923_v58 }
  0xe4   :  { %430 = vst [vmem:[%s1258_s2 + $0x170] sm:$0xff] %v1172_v8 }
  0xe5   :  { %v445_v26 = vadd.f32 %v444_v23, %v914_v57  ;;  %v547_v27 = vadd.f32 %v546_v24, %v499_v22  ;;  %v503_v57 = vmul.f32 %v959_v2, %v959_v2 }
  0xe7   :  { %v446_v29 = vadd.f32 %v445_v26, %v929_v60  ;;  %v548_v30 = vadd.f32 %v547_v27, %v500_v25  ;;  %v504_v60 = vmul.f32 %v974_v5, %v974_v5 }
  0xe9   :  { %v447_v34 = vadd.f32 %v446_v29, %v944_v63  ;;  %v549_v35 = vadd.f32 %v548_v30, %v501_v55  ;;  %v1130_v36 = vpop.f32.mrf.mxu2  ;;  %v515_v29 = vmul.f32 %v983_v6, %v983_v6 }
  0xea   :  { %419 = vst [vmem:[%s1258_s2 + $0x118] sm:$0xff] %v1130_v36 }
  0xeb   :  { %v550_v38 = vadd.f32 %v549_v35, %v502_v31  ;;  %v448_v39 = vadd.f32 %v447_v34, %v959_v2  ;;  %v378_v55 = vpop.f32.mrf.mxu3 }
  0xec   :  { %431 = vst [vmem:[%s1258_s2 + $0x178] sm:$0xff] %v378_v55 }
  0xed   :  { %v449_v63 = vadd.f32 %v448_v39, %v974_v5  ;;  %v551_v40 = vadd.f32 %v550_v38, %v503_v57  ;;  %v507_v5 = vmul.f32 %v1037_v17, %v1037_v17 }
  0xef   :  { %v450_v2 = vadd.f32 %v449_v63, %v995_v9  ;;  %v552_v42 = vadd.f32 %v551_v40, %v504_v60  ;;  %v519_v63 = vmul.f32 %v1067_v32, %v1067_v32 }
  0xf1   :  { %v451_v45 = vadd.f32 %v450_v2, %v1016_v13  ;;  %v553_v46 = vadd.f32 %v552_v42, %v505_v41  ;;  %v345_v47 = vpop.f32.mrf.mxu2 }
  0xf2   :  { %420 = vst [vmem:[%s1258_s2 + $0x120] sm:$0xff] %v345_v47 }
  0xf3   :  { %v452_v51 = vadd.f32 %v451_v45, %v1037_v17  ;;  %v554_v52 = vadd.f32 %v553_v46, %v506_v43  ;;  %v509_v17 = vmul.f32 %v1079_v44, %v1079_v44  ;;  %v381_v60 = vpop.f32.mrf.mxu3  ;;  %v521_v43 = vmul.f32 %v1106_v20, %v1106_v20 }
  0xf4   :  { %432 = vst [vmem:[%s1258_s2 + $0x180] sm:$0xff] %v381_v60  ;;  %v522_v46 = vmul.f32 %v1130_v36, %v1130_v36 }
  0xf5   :  { %v555_v9 = vadd.f32 %v554_v52, %v507_v5  ;;  %v453_v13 = vadd.f32 %v452_v51, %v1058_v28  ;;  %v512_v28 = vmul.f32 %v938_v61, %v938_v61  ;;  %v523_v51 = vmul.f32 %v345_v47, %v345_v47 }
  0xf7   :  { %v556_v54 = vadd.f32 %v555_v9, %v508_v53  ;;  %v454_v56 = vadd.f32 %v453_v13, %v1079_v44  ;;  %v524_v9 = vmul.f32 %v985_v7, %v985_v7  ;;  %v525_v53 = vmul.f32 %v1006_v11, %v1006_v11 }
  0xf9   :  { %v557_v62 = vadd.f32 %v556_v54, %v509_v17  ;;  %v455_v1 = vadd.f32 %v454_v56, %v306_v4  ;;  %v513_v4 = vmul.f32 %v953_v0, %v953_v0  ;;  %v526_v56 = vmul.f32 %v1027_v15, %v1027_v15 }
  0xfb   :  { %v456_v16 = vadd.f32 %v455_v1, %v923_v58  ;;  %v558_v22 = vadd.f32 %v557_v62, %v510_v59  ;;  %v514_v58 = vmul.f32 %v968_v3, %v968_v3 }
  0xfd   :  { %v457_v44 = vadd.f32 %v456_v16, %v938_v61  ;;  %v559_v23 = vadd.f32 %v558_v22, %v511_v12 }
  0xff   :  { %v458_v24 = vadd.f32 %v457_v44, %v953_v0  ;;  %v560_v25 = vadd.f32 %v559_v23, %v512_v28  ;;  %v516_v0 = vmul.f32 %v1004_v10, %v1004_v10 }
 0x101   :  { %v459_v26 = vadd.f32 %v458_v24, %v968_v3  ;;  %v561_v27 = vadd.f32 %v560_v25, %v513_v4  ;;  %v517_v3 = vmul.f32 %v1025_v14, %v1025_v14  ;;  %v532_v24 = vmul.f32 %v1154_v50, %v1154_v50 }
 0x103   :  { %v460_v30 = vadd.f32 %v459_v26, %v983_v6  ;;  %v562_v61 = vadd.f32 %v561_v27, %v514_v58  ;;  %v518_v6 = vmul.f32 %v1046_v18, %v1046_v18  ;;  %v533_v26 = vmul.f32 %v1172_v8, %v1172_v8 }
 0x105   :  { %v563_v31 = vadd.f32 %v562_v61, %v515_v29  ;;  %v461_v34 = vadd.f32 %v460_v30, %v1004_v10  ;;  %v534_v29 = vmul.f32 %v378_v55, %v378_v55  ;;  %v535_v30 = vmul.f32 %v381_v60, %v381_v60 }
 0x107   :  { %v462_v35 = vadd.f32 %v461_v34, %v1025_v14  ;;  %v564_v57 = vadd.f32 %v563_v31, %v516_v0  ;;  %v520_v14 = vmul.f32 %v1088_v48, %v1088_v48 }
 0x109   :  { %v463_v38 = vadd.f32 %v462_v35, %v1046_v18  ;;  %v565_v39 = vadd.f32 %v564_v57, %v517_v3 }
 0x10b   :  { %v464_v40 = vadd.f32 %v463_v38, %v1067_v32  ;;  %v566_v41 = vadd.f32 %v565_v39, %v518_v6 }
 0x10d   :  { %v465_v10 = vadd.f32 %v464_v40, %v1088_v48  ;;  %v567_v2 = vadd.f32 %v566_v41, %v519_v63 }
 0x10f   :  { %v568_v42 = vadd.f32 %v567_v2, %v520_v14  ;;  %v466_v18 = vadd.f32 %v465_v10, %v1106_v20 }
 0x111   :  { %v569_v45 = vadd.f32 %v568_v42, %v521_v43  ;;  %v467_v32 = vadd.f32 %v466_v18, %v1130_v36 }
 0x113   :  { %v570_v5 = vadd.f32 %v569_v45, %v522_v46  ;;  %v468_v52 = vadd.f32 %v467_v32, %v345_v47  ;;  %v527_v47 = vmul.f32 %v1048_v19, %v1048_v19 }
 0x115   :  { %v469_v48 = vadd.f32 %v468_v52, %v985_v7  ;;  %v571_v13 = vadd.f32 %v570_v5, %v523_v51  ;;  %v528_v7 = vmul.f32 %v1069_v33, %v1069_v33 }
 0x117   :  { %v470_v20 = vadd.f32 %v469_v48, %v1006_v11  ;;  %v572_v54 = vadd.f32 %v571_v13, %v524_v9  ;;  %v529_v11 = vmul.f32 %v1090_v49, %v1090_v49 }
 0x119   :  { %v471_v36 = vadd.f32 %v470_v20, %v1027_v15  ;;  %v573_v17 = vadd.f32 %v572_v54, %v525_v53  ;;  %v530_v15 = vmul.f32 %v1108_v21, %v1108_v21 }
 0x11b   :  { %v472_v59 = vadd.f32 %v471_v36, %v1048_v19  ;;  %v574_v62 = vadd.f32 %v573_v17, %v526_v56  ;;  %v531_v19 = vmul.f32 %v1132_v37, %v1132_v37 }
 0x11d   :  { %v575_v1 = vadd.f32 %v574_v62, %v527_v47  ;;  %v473_v12 = vadd.f32 %v472_v59, %v1069_v33 }
 0x11f   :  { %v474_v16 = vadd.f32 %v473_v12, %v1090_v49  ;;  %v576_v22 = vadd.f32 %v575_v1, %v528_v7 }
 0x121   :  { %v475_v28 = vadd.f32 %v474_v16, %v1108_v21  ;;  %v577_v44 = vadd.f32 %v576_v22, %v529_v11 }
 0x123   :  { %v476_v23 = vadd.f32 %v475_v28, %v1132_v37  ;;  %v578_v4 = vadd.f32 %v577_v44, %v530_v15 }
 0x125   :  { %v477_v33 = vadd.f32 %v476_v23, %v1154_v50  ;;  %v579_v25 = vadd.f32 %v578_v4, %v531_v19 }
 0x127   :  { %v580_v49 = vadd.f32 %v579_v25, %v532_v24  ;;  %v478_v58 = vadd.f32 %v477_v33, %v1172_v8 }
 0x129   :  { %v581_v21 = vadd.f32 %v580_v49, %v533_v26  ;;  %v479_v27 = vadd.f32 %v478_v58, %v378_v55 }
 0x12b   :  { %v582_v61 = vadd.f32 %v581_v21, %v534_v29  ;;  %v480_v0 = vadd.f32 %v479_v27, %v381_v60 }
 0x12d   :  { %v481_v37 = vrot.slane %v480_v0, 4  ;;  %v583_v31 = vadd.f32 %v582_v61, %v535_v30 }
 0x12f   :  { %v482_v34 = vadd.f32 %v481_v37, %v480_v0  ;;  %v584_v3 = vrot.slane %v583_v31, 4 }
 0x131   :  { %v483_v35 = vrot.slane %v482_v34, 2  ;;  %v585_v57 = vadd.f32 %v584_v3, %v583_v31 }
 0x133   :  { %v484_v50 = vadd.f32 %v483_v35, %v482_v34  ;;  %v586_v6 = vrot.slane %v585_v57, 2 }
 0x135   :  { %v485_v38 = vrot.slane %v484_v50, 1  ;;  %v587_v39 = vadd.f32 %v586_v6, %v585_v57 }
 0x137   :  { %v486_v63 = vadd.f32 %v485_v38, %v484_v50  ;;  %v588_v40 = vrot.slane %v587_v39, 1 }
 0x139   :  { %v589_v41 = vadd.f32 %v588_v40, %v587_v39  ;;  %590 = vst [vmem:[%s1259_s3] sm:$0xff] %v486_v63 }
 0x13b   :  { %591 = vst [vmem:[%s1260_s4] sm:$0xff] %v589_v41 }

</bundles_post_ra>
